<compile_context>
chip_gen: v5e
topology: v5e:2x2
jax: 0.10.0
libtpu: 0.0.40
codegen_flags: <defaults>
</compile_context>

<pallas_src>
import functools

import numpy as np
import jax
import jax.numpy as jnp
from jax import lax
from jax.experimental import pallas as pl
from jax.experimental.pallas import tpu as pltpu


# Large finite negative instead of -inf: avoids inf - inf -> NaN in the online-softmax rescale.
_MASK_VALUE = -0.7 * float(jnp.finfo(jnp.float32).max)


def _flash_head_kernel(qi_tbl, ki_tbl, q_ref, k_ref, v_ref, o_ref,
                       m_sc, l_sc, acc_sc, *, tq, tk):
    # qi_tbl/ki_tbl: SMEM scalar-prefetch tables mapping flat step -> (q tile, kv tile)
    # q_ref: (1, tq, H)   pre-projected, pre-scaled query tile (compute dtype)
    # k_ref/v_ref: (1, tk, H) pre-projected key/value tiles (compute dtype)
    # o_ref: (1, tq, H)
    # m_sc/l_sc: (tq, 1) f32 online-softmax running max / denominator
    # acc_sc: (tq, H) f32 output accumulator
    step = pl.program_id(1)
    qi = qi_tbl[step]
    ki = ki_tbl[step]

    # ---- per (batch, q-tile) init: first kv step for this q tile ----
    @pl.when(ki == 0)
    def _init():
        m_sc[...] = jnp.full(m_sc.shape, _MASK_VALUE, m_sc.dtype)
        l_sc[...] = jnp.zeros(l_sc.shape, l_sc.dtype)
        acc_sc[...] = jnp.zeros(acc_sc.shape, acc_sc.dtype)

    def attn_step(masked):
        q = q_ref[0]                                                  # (tq, H) compute dtype
        k = k_ref[0]                                                  # (tk, H)
        # scores: contract on the head axis directly (no explicit k transpose / XLU)
        s = lax.dot_general(q, k,
                            dimension_numbers=(((1,), (1,)), ((), ())),
                            preferred_element_type=jnp.float32)       # (tq, tk) f32
        if masked:
            # only the diagonal block needs masking; tq == tk so block offsets cancel
            row = lax.broadcasted_iota(jnp.int32, (tq, tk), 0)
            col = lax.broadcasted_iota(jnp.int32, (tq, tk), 1)
            s = jnp.where(col <= row, s, _MASK_VALUE)

        m_prev = m_sc[...]
        m_new = jnp.maximum(m_prev, jnp.max(s, axis=-1, keepdims=True))
        alpha = jnp.exp(m_prev - m_new)
        p = jnp.exp(s - m_new)
        l_sc[...] = alpha * l_sc[...] + jnp.sum(p, axis=-1, keepdims=True)
        acc_sc[...] = alpha * acc_sc[...] + jnp.dot(
            p.astype(v_ref.dtype), v_ref[0], preferred_element_type=jnp.float32)
        m_sc[...] = m_new

    # ---- off-diagonal blocks: mask-free fast path ----
    @pl.when(ki < qi)
    def _off_diag():
        attn_step(masked=False)

    # ---- diagonal block: masked path; it is always the last kv step, so finalize here ----
    @pl.when(ki == qi)
    def _diag_and_finalize():
        attn_step(masked=True)
        inv_l = pl.reciprocal(l_sc[...], approx=False)   # exact; once per q tile
        o_ref[0] = (acc_sc[...] * inv_l).astype(o_ref.dtype)


def head_forward(x, w_key, w_query, w_value, *, block_q=256, block_k=256,
                 compute_dtype=jnp.bfloat16):
    """Single causal attention head forward.

    x: (B, T, C); weights: (C, H).  Returns (B, T, H) in x.dtype.
    block_q/block_k: 256 targets the v6e/v7x 2x256^2 MXU; use 128 on v5e.
    compute_dtype: MXU operand dtype (f32 accumulation is always used).
    """
    B, T, C = x.shape
    H = w_key.shape[1]
    scale = float(H) ** -0.5

    tq = min(block_q, T)
    tk = min(block_k, T)
    # causal step packing + diagonal-only masking assume square tiles
    assert tq == tk, "block_q and block_k must match"
    assert T % tq == 0, "sequence length must be divisible by the tile size"
    nq = T // tq

    # ---- fused projection in XLA (runs once); fold the softmax scale into Wq ----
    w_qkv = jnp.concatenate([w_query * scale, w_key, w_value], axis=1).astype(compute_dtype)
    qkv = jnp.dot(x.astype(compute_dtype), w_qkv, preferred_element_type=jnp.float32)
    q, k, v = (t.astype(compute_dtype) for t in jnp.split(qkv, 3, axis=-1))  # each (B, T, H)

    # ---- packed lower-triangular (qi, ki) step tables (qi ascending, ki ascending) ----
    qi_idx, ki_idx = np.tril_indices(nq)
    qi_tbl = jnp.asarray(qi_idx, dtype=jnp.int32)
    ki_tbl = jnp.asarray(ki_idx, dtype=jnp.int32)
    n_steps = int(qi_tbl.shape[0])

    kernel = functools.partial(_flash_head_kernel, tq=tq, tk=tk)

    out = pl.pallas_call(
        kernel,
        out_shape=jax.ShapeDtypeStruct((B, T, H), x.dtype),
        grid_spec=pltpu.PrefetchScalarGridSpec(
            num_scalar_prefetch=2,
            grid=(B, n_steps),
            in_specs=[
                # q tile: index unchanged across a q-tile's kv steps -> stays resident, no re-DMA
                pl.BlockSpec((1, tq, H), lambda b, s, qt, kt: (b, qt[s], 0)),
                # k/v tiles
                # (on v5e, add pipeline_mode=pl.Buffered(3) here if the trace shows exposed DMA)
                pl.BlockSpec((1, tk, H), lambda b, s, qt, kt: (b, kt[s], 0)),
                pl.BlockSpec((1, tk, H), lambda b, s, qt, kt: (b, kt[s], 0)),
            ],
            # full-extent head dim -> no padding, no wrapper slice copy
            out_specs=pl.BlockSpec((1, tq, H), lambda b, s, qt, kt: (b, qt[s], 0)),
            scratch_shapes=[
                pltpu.VMEM((tq, 1), jnp.float32),   # running max m
                pltpu.VMEM((tq, 1), jnp.float32),   # running denominator l
                pltpu.VMEM((tq, H), jnp.float32),   # output accumulator
            ],
        ),
        compiler_params=pltpu.CompilerParams(
            # batch axis parallel (megacore shards on v7x); packed causal axis sequential
            dimension_semantics=("parallel", "arbitrary"),
        ),
    )(qi_tbl, ki_tbl, q, k, v)
    return out


def head_reference(x, w_key, w_query, w_value):
    """Pure-JAX reference matching the PyTorch forward."""
    B, T, C = x.shape
    H = w_key.shape[1]
    k = x @ w_key
    q = x @ w_query
    v = x @ w_value
    wei = (q @ jnp.swapaxes(k, -2, -1)) * (H ** -0.5)
    tril = jnp.tril(jnp.ones((T, T), dtype=bool))
    wei = jnp.where(tril, wei, -jnp.inf)
    wei = jax.nn.softmax(wei, axis=-1)
    return wei @ v


if __name__ == "__main__":
    # make the XLA-side matmuls (reference + fused projection) full f32 precision
    jax.config.update("jax_default_matmul_precision", "highest")

    # small config: batch=2, block_size (seq) = 8, n_embd = 32, n_head = 4 -> head_size = 8
    B, T, C, n_head = 2, 8, 32, 4
    H = C // n_head

    key = jax.random.PRNGKey(0)
    kx, kk, kq, kv = jax.random.split(key, 4)

    x = jax.random.normal(kx, (B, T, C), dtype=jnp.float32)
    # deterministic "Linear" weight init (no bias), stored as (in, out) = (C, H)
    w_key = jax.random.normal(kk, (C, H), dtype=jnp.float32) * (C ** -0.5)
    w_query = jax.random.normal(kq, (C, H), dtype=jnp.float32) * (C ** -0.5)
    w_value = jax.random.normal(kv, (C, H), dtype=jnp.float32) * (C ** -0.5)

    ref = head_reference(x, w_key, w_query, w_value)

    # f32 MXU operands: tight agreement with the reference
    out_f32 = jax.block_until_ready(
        head_forward(x, w_key, w_query, w_value, compute_dtype=jnp.float32))
    assert out_f32.shape == (B, T, H), out_f32.shape
    assert jnp.allclose(out_f32, ref, atol=1e-2, rtol=1e-2), \
        float(jnp.max(jnp.abs(out_f32 - ref)))

    # bf16 MXU operands, f32 accumulation (recommended fast path on all generations)
    out_bf16 = jax.block_until_ready(
        head_forward(x, w_key, w_query, w_value, compute_dtype=jnp.bfloat16))
    assert out_bf16.shape == (B, T, H), out_bf16.shape
    assert jnp.allclose(out_bf16, ref, atol=1e-1, rtol=1e-1), \
        float(jnp.max(jnp.abs(out_bf16 - ref)))

    print("KERNEL_OK")
</pallas_src>

<mosaic_0001>
module attributes {stable_mosaic.version = 11 : i64} {
  func.func @_flash_head_kernel(%arg0: i32, %arg1: i32, %arg2: memref<1xi32, #tpu.memory_space<smem>>, %arg3: memref<1xi32, #tpu.memory_space<smem>>, %arg4: memref<1x8x8xf32, #tpu.memory_space<vmem>>, %arg5: memref<1x8x8xf32, #tpu.memory_space<vmem>>, %arg6: memref<1x8x8xf32, #tpu.memory_space<vmem>>, %arg7: memref<1x8x8xf32, #tpu.memory_space<vmem>>, %arg8: memref<8x1xf32, #tpu.memory_space<vmem>>, %arg9: memref<8x1xf32, #tpu.memory_space<vmem>>, %arg10: memref<8x8xf32, #tpu.memory_space<vmem>>) attributes {dimension_semantics = [#tpu.dimension_semantics<parallel>, #tpu.dimension_semantics<arbitrary>], iteration_bounds = array<i64: 2, 1>, scalar_prefetch = 2 : i64, scratch_operands = 3 : i64, tpu.core_type = #tpu.core_type<tc>, window_params = [{transform_indices = @transform_0, window_bounds = array<i64: 1, 8, 8>}, {transform_indices = @transform_1, window_bounds = array<i64: 1, 8, 8>}, {transform_indices = @transform_2, window_bounds = array<i64: 1, 8, 8>}, {transform_indices = @transform_3, window_bounds = array<i64: 1, 8, 8>}]} {
    %0 = arith.index_cast %arg1 : i32 to index
    %1 = memref.load %arg2[%0] : memref<1xi32, #tpu.memory_space<smem>>
    %2 = arith.index_cast %arg1 : i32 to index
    %3 = memref.load %arg3[%2] : memref<1xi32, #tpu.memory_space<smem>>
    %c0_i32 = arith.constant 0 : i32
    %4 = arith.cmpi eq, %3, %c0_i32 : i32
    %5 = arith.extui %4 : i1 to i32
    %c0_i32_0 = arith.constant 0 : i32
    %6 = arith.cmpi ne, %5, %c0_i32_0 : i32
    scf.if %6 {
      %cst = arith.constant -2.38197633E+38 : f32
      %13 = vector.broadcast %cst : f32 to vector<8x1xf32>
      %c0 = arith.constant 0 : index
      %c0_3 = arith.constant 0 : index
      %14 = vector.load %arg8[%c0, %c0_3] : memref<8x1xf32, #tpu.memory_space<vmem>>, vector<8x1xf32>
      tpu.vector_store %arg8[%c0, %c0_3], %13 {strides = array<i32>} : memref<8x1xf32, #tpu.memory_space<vmem>>, vector<8x1xf32>,
      %cst_4 = arith.constant 0.000000e+00 : f32
      %15 = vector.broadcast %cst_4 : f32 to vector<8x1xf32>
      %c0_5 = arith.constant 0 : index
      %c0_6 = arith.constant 0 : index
      %16 = vector.load %arg9[%c0_5, %c0_6] : memref<8x1xf32, #tpu.memory_space<vmem>>, vector<8x1xf32>
      tpu.vector_store %arg9[%c0_5, %c0_6], %15 {strides = array<i32>} : memref<8x1xf32, #tpu.memory_space<vmem>>, vector<8x1xf32>,
      %cst_7 = arith.constant 0.000000e+00 : f32
      %17 = vector.broadcast %cst_7 : f32 to vector<8x8xf32>
      %c0_8 = arith.constant 0 : index
      %c0_9 = arith.constant 0 : index
      %18 = vector.load %arg10[%c0_8, %c0_9] : memref<8x8xf32, #tpu.memory_space<vmem>>, vector<8x8xf32>
      tpu.vector_store %arg10[%c0_8, %c0_9], %17 {strides = array<i32>} : memref<8x8xf32, #tpu.memory_space<vmem>>, vector<8x8xf32>,
    } else {
    }
    %7 = arith.cmpi slt, %3, %1 : i32
    %8 = arith.extui %7 : i1 to i32
    %c0_i32_1 = arith.constant 0 : i32
    %9 = arith.cmpi ne, %8, %c0_i32_1 : i32
    scf.if %9 {
      %c0 = arith.constant 0 : index
      %c0_3 = arith.constant 0 : index
      %c0_4 = arith.constant 0 : index
      %13 = vector.load %arg4[%c0, %c0_3, %c0_4] : memref<1x8x8xf32, #tpu.memory_space<vmem>>, vector<1x8x8xf32>
      %14 = vector.shape_cast %13 : vector<1x8x8xf32> to vector<8x8xf32>
      %c0_5 = arith.constant 0 : index
      %c0_6 = arith.constant 0 : index
      %c0_7 = arith.constant 0 : index
      %15 = vector.load %arg5[%c0_5, %c0_6, %c0_7] : memref<1x8x8xf32, #tpu.memory_space<vmem>>, vector<1x8x8xf32>
      %16 = vector.shape_cast %15 : vector<1x8x8xf32> to vector<8x8xf32>
      %cst = arith.constant dense<0.000000e+00> : vector<8x8xf32>
      %17 = tpu.matmul %14, %16, %cst {dimension_numbers = #tpu.dot_dimension_numbers<[1], [1], [0], [0], [0, 0, 1, 0], [], []>, precision = #tpu.contract_precision<fp32>} : vector<8x8xf32>, vector<8x8xf32>, vector<8x8xf32> -> vector<8x8xf32>
      %c0_8 = arith.constant 0 : index
      %c0_9 = arith.constant 0 : index
      %18 = vector.load %arg8[%c0_8, %c0_9] : memref<8x1xf32, #tpu.memory_space<vmem>>, vector<8x1xf32>
      %cst_10 = arith.constant dense<0xFF800000> : vector<8xf32>
      %19 = vector.multi_reduction <maximumf>, %17, %cst_10 [1] : vector<8x8xf32> to vector<8xf32>
      %20 = vector.shape_cast %19 : vector<8xf32> to vector<8x1xf32>
      %21 = arith.maximumf %18, %20 : vector<8x1xf32>
      %22 = arith.subf %18, %21 : vector<8x1xf32>
      %23 = math.exp %22 : vector<8x1xf32>
      %24 = vector.broadcast %21 : vector<8x1xf32> to vector<8x8xf32>
      %25 = arith.subf %17, %24 : vector<8x8xf32>
      %26 = math.exp %25 : vector<8x8xf32>
      %c0_11 = arith.constant 0 : index
      %c0_12 = arith.constant 0 : index
      %27 = vector.load %arg9[%c0_11, %c0_12] : memref<8x1xf32, #tpu.memory_space<vmem>>, vector<8x1xf32>
      %28 = arith.mulf %23, %27 : vector<8x1xf32>
      %cst_13 = arith.constant dense<0.000000e+00> : vector<8xf32>
      %29 = vector.multi_reduction <add>, %26, %cst_13 [1] : vector<8x8xf32> to vector<8xf32>
      %30 = vector.shape_cast %29 : vector<8xf32> to vector<8x1xf32>
      %31 = arith.addf %28, %30 : vector<8x1xf32>
      %c0_14 = arith.constant 0 : index
      %c0_15 = arith.constant 0 : index
      %32 = vector.load %arg9[%c0_14, %c0_15] : memref<8x1xf32, #tpu.memory_space<vmem>>, vector<8x1xf32>
      tpu.vector_store %arg9[%c0_14, %c0_15], %31 {strides = array<i32>} : memref<8x1xf32, #tpu.memory_space<vmem>>, vector<8x1xf32>,
      %c0_16 = arith.constant 0 : index
      %c0_17 = arith.constant 0 : index
      %33 = vector.load %arg10[%c0_16, %c0_17] : memref<8x8xf32, #tpu.memory_space<vmem>>, vector<8x8xf32>
      %34 = vector.broadcast %23 : vector<8x1xf32> to vector<8x8xf32>
      %35 = arith.mulf %34, %33 : vector<8x8xf32>
      %c0_18 = arith.constant 0 : index
      %c0_19 = arith.constant 0 : index
      %c0_20 = arith.constant 0 : index
      %36 = vector.load %arg6[%c0_18, %c0_19, %c0_20] : memref<1x8x8xf32, #tpu.memory_space<vmem>>, vector<1x8x8xf32>
      %37 = vector.shape_cast %36 : vector<1x8x8xf32> to vector<8x8xf32>
      %cst_21 = arith.constant dense<0.000000e+00> : vector<8x8xf32>
      %38 = tpu.matmul %26, %37, %cst_21 {dimension_numbers = #tpu.dot_dimension_numbers<[1], [0], [0], [1], [0, 0, 1, 1], [], []>, precision = #tpu.contract_precision<fp32>} : vector<8x8xf32>, vector<8x8xf32>, vector<8x8xf32> -> vector<8x8xf32>
      %39 = arith.addf %35, %38 : vector<8x8xf32>
      %c0_22 = arith.constant 0 : index
      %c0_23 = arith.constant 0 : index
      %40 = vector.load %arg10[%c0_22, %c0_23] : memref<8x8xf32, #tpu.memory_space<vmem>>, vector<8x8xf32>
      tpu.vector_store %arg10[%c0_22, %c0_23], %39 {strides = array<i32>} : memref<8x8xf32, #tpu.memory_space<vmem>>, vector<8x8xf32>,
      %c0_24 = arith.constant 0 : index
      %c0_25 = arith.constant 0 : index
      %41 = vector.load %arg8[%c0_24, %c0_25] : memref<8x1xf32, #tpu.memory_space<vmem>>, vector<8x1xf32>
      tpu.vector_store %arg8[%c0_24, %c0_25], %21 {strides = array<i32>} : memref<8x1xf32, #tpu.memory_space<vmem>>, vector<8x1xf32>,
    } else {
    }
    %10 = arith.cmpi eq, %3, %1 : i32
    %11 = arith.extui %10 : i1 to i32
    %c0_i32_2 = arith.constant 0 : i32
    %12 = arith.cmpi ne, %11, %c0_i32_2 : i32
    scf.if %12 {
      %c0 = arith.constant 0 : index
      %c0_3 = arith.constant 0 : index
      %c0_4 = arith.constant 0 : index
      %13 = vector.load %arg4[%c0, %c0_3, %c0_4] : memref<1x8x8xf32, #tpu.memory_space<vmem>>, vector<1x8x8xf32>
      %14 = vector.shape_cast %13 : vector<1x8x8xf32> to vector<8x8xf32>
      %c0_5 = arith.constant 0 : index
      %c0_6 = arith.constant 0 : index
      %c0_7 = arith.constant 0 : index
      %15 = vector.load %arg5[%c0_5, %c0_6, %c0_7] : memref<1x8x8xf32, #tpu.memory_space<vmem>>, vector<1x8x8xf32>
      %16 = vector.shape_cast %15 : vector<1x8x8xf32> to vector<8x8xf32>
      %cst = arith.constant dense<0.000000e+00> : vector<8x8xf32>
      %17 = tpu.matmul %14, %16, %cst {dimension_numbers = #tpu.dot_dimension_numbers<[1], [1], [0], [0], [0, 0, 1, 0], [], []>, precision = #tpu.contract_precision<fp32>} : vector<8x8xf32>, vector<8x8xf32>, vector<8x8xf32> -> vector<8x8xf32>
      %18 = tpu.iota {dimensions = array<i32: 0>} : vector<8x8xi32>
      %19 = tpu.iota {dimensions = array<i32: 1>} : vector<8x8xi32>
      %20 = arith.cmpi sle, %19, %18 : vector<8x8xi32>
      %cst_8 = arith.constant -2.38197633E+38 : f32
      %21 = vector.broadcast %cst_8 : f32 to vector<8x8xf32>
      %22 = arith.select %20, %17, %21 : vector<8x8xi1>, vector<8x8xf32>
      %c0_9 = arith.constant 0 : index
      %c0_10 = arith.constant 0 : index
      %23 = vector.load %arg8[%c0_9, %c0_10] : memref<8x1xf32, #tpu.memory_space<vmem>>, vector<8x1xf32>
      %cst_11 = arith.constant dense<0xFF800000> : vector<8xf32>
      %24 = vector.multi_reduction <maximumf>, %22, %cst_11 [1] : vector<8x8xf32> to vector<8xf32>
      %25 = vector.shape_cast %24 : vector<8xf32> to vector<8x1xf32>
      %26 = arith.maximumf %23, %25 : vector<8x1xf32>
      %27 = arith.subf %23, %26 : vector<8x1xf32>
      %28 = math.exp %27 : vector<8x1xf32>
      %29 = vector.broadcast %26 : vector<8x1xf32> to vector<8x8xf32>
      %30 = arith.subf %22, %29 : vector<8x8xf32>
      %31 = math.exp %30 : vector<8x8xf32>
      %c0_12 = arith.constant 0 : index
      %c0_13 = arith.constant 0 : index
      %32 = vector.load %arg9[%c0_12, %c0_13] : memref<8x1xf32, #tpu.memory_space<vmem>>, vector<8x1xf32>
      %33 = arith.mulf %28, %32 : vector<8x1xf32>
      %cst_14 = arith.constant dense<0.000000e+00> : vector<8xf32>
      %34 = vector.multi_reduction <add>, %31, %cst_14 [1] : vector<8x8xf32> to vector<8xf32>
      %35 = vector.shape_cast %34 : vector<8xf32> to vector<8x1xf32>
      %36 = arith.addf %33, %35 : vector<8x1xf32>
      %c0_15 = arith.constant 0 : index
      %c0_16 = arith.constant 0 : index
      %37 = vector.load %arg9[%c0_15, %c0_16] : memref<8x1xf32, #tpu.memory_space<vmem>>, vector<8x1xf32>
      tpu.vector_store %arg9[%c0_15, %c0_16], %36 {strides = array<i32>} : memref<8x1xf32, #tpu.memory_space<vmem>>, vector<8x1xf32>,
      %c0_17 = arith.constant 0 : index
      %c0_18 = arith.constant 0 : index
      %38 = vector.load %arg10[%c0_17, %c0_18] : memref<8x8xf32, #tpu.memory_space<vmem>>, vector<8x8xf32>
      %39 = vector.broadcast %28 : vector<8x1xf32> to vector<8x8xf32>
      %40 = arith.mulf %39, %38 : vector<8x8xf32>
      %c0_19 = arith.constant 0 : index
      %c0_20 = arith.constant 0 : index
      %c0_21 = arith.constant 0 : index
      %41 = vector.load %arg6[%c0_19, %c0_20, %c0_21] : memref<1x8x8xf32, #tpu.memory_space<vmem>>, vector<1x8x8xf32>
      %42 = vector.shape_cast %41 : vector<1x8x8xf32> to vector<8x8xf32>
      %cst_22 = arith.constant dense<0.000000e+00> : vector<8x8xf32>
      %43 = tpu.matmul %31, %42, %cst_22 {dimension_numbers = #tpu.dot_dimension_numbers<[1], [0], [0], [1], [0, 0, 1, 1], [], []>, precision = #tpu.contract_precision<fp32>} : vector<8x8xf32>, vector<8x8xf32>, vector<8x8xf32> -> vector<8x8xf32>
      %44 = arith.addf %40, %43 : vector<8x8xf32>
      %c0_23 = arith.constant 0 : index
      %c0_24 = arith.constant 0 : index
      %45 = vector.load %arg10[%c0_23, %c0_24] : memref<8x8xf32, #tpu.memory_space<vmem>>, vector<8x8xf32>
      tpu.vector_store %arg10[%c0_23, %c0_24], %44 {strides = array<i32>} : memref<8x8xf32, #tpu.memory_space<vmem>>, vector<8x8xf32>,
      %c0_25 = arith.constant 0 : index
      %c0_26 = arith.constant 0 : index
      %46 = vector.load %arg8[%c0_25, %c0_26] : memref<8x1xf32, #tpu.memory_space<vmem>>, vector<8x1xf32>
      tpu.vector_store %arg8[%c0_25, %c0_26], %26 {strides = array<i32>} : memref<8x1xf32, #tpu.memory_space<vmem>>, vector<8x1xf32>,
      %c0_27 = arith.constant 0 : index
      %c0_28 = arith.constant 0 : index
      %47 = vector.load %arg9[%c0_27, %c0_28] : memref<8x1xf32, #tpu.memory_space<vmem>>, vector<8x1xf32>
      %48 = tpu.reciprocal %47 : vector<8x1xf32> -> vector<8x1xf32>
      %c0_29 = arith.constant 0 : index
      %c0_30 = arith.constant 0 : index
      %49 = vector.load %arg10[%c0_29, %c0_30] : memref<8x8xf32, #tpu.memory_space<vmem>>, vector<8x8xf32>
      %50 = vector.broadcast %48 : vector<8x1xf32> to vector<8x8xf32>
      %51 = arith.mulf %49, %50 : vector<8x8xf32>
      %c0_31 = arith.constant 0 : index
      %c0_32 = arith.constant 0 : index
      %c0_33 = arith.constant 0 : index
      %52 = vector.load %arg7[%c0_31, %c0_32, %c0_33] : memref<1x8x8xf32, #tpu.memory_space<vmem>>, vector<1x8x8xf32>
      %53 = vector.shape_cast %52 : vector<1x8x8xf32> to vector<8x8xf32>
      %54 = vector.shape_cast %51 : vector<8x8xf32> to vector<1x8x8xf32>
      tpu.vector_store %arg7[%c0_31, %c0_32, %c0_33], %54 {strides = array<i32>} : memref<1x8x8xf32, #tpu.memory_space<vmem>>, vector<1x8x8xf32>,
    } else {
    }
    return
  }
  func.func @transform_0(%arg0: i32, %arg1: i32, %arg2: memref<1xi32, #tpu.memory_space<smem>>, %arg3: memref<1xi32, #tpu.memory_space<smem>>) -> (i32, i32, i32) {
    %0 = arith.index_cast %arg1 : i32 to index
    %1 = memref.load %arg2[%0] : memref<1xi32, #tpu.memory_space<smem>>
    %c0_i32 = arith.constant 0 : i32
    %c0_i32_0 = arith.constant 0 : i32
    return %arg0, %1, %c0_i32 : i32, i32, i32
  }
  func.func @transform_1(%arg0: i32, %arg1: i32, %arg2: memref<1xi32, #tpu.memory_space<smem>>, %arg3: memref<1xi32, #tpu.memory_space<smem>>) -> (i32, i32, i32) {
    %0 = arith.index_cast %arg1 : i32 to index
    %1 = memref.load %arg3[%0] : memref<1xi32, #tpu.memory_space<smem>>
    %c0_i32 = arith.constant 0 : i32
    %c0_i32_0 = arith.constant 0 : i32
    return %arg0, %1, %c0_i32 : i32, i32, i32
  }
  func.func @transform_2(%arg0: i32, %arg1: i32, %arg2: memref<1xi32, #tpu.memory_space<smem>>, %arg3: memref<1xi32, #tpu.memory_space<smem>>) -> (i32, i32, i32) {
    %0 = arith.index_cast %arg1 : i32 to index
    %1 = memref.load %arg3[%0] : memref<1xi32, #tpu.memory_space<smem>>
    %c0_i32 = arith.constant 0 : i32
    %c0_i32_0 = arith.constant 0 : i32
    return %arg0, %1, %c0_i32 : i32, i32, i32
  }
  func.func @transform_3(%arg0: i32, %arg1: i32, %arg2: memref<1xi32, #tpu.memory_space<smem>>, %arg3: memref<1xi32, #tpu.memory_space<smem>>) -> (i32, i32, i32) {
    %0 = arith.index_cast %arg1 : i32 to index
    %1 = memref.load %arg2[%0] : memref<1xi32, #tpu.memory_space<smem>>
    %c0_i32 = arith.constant 0 : i32
    %c0_i32_0 = arith.constant 0 : i32
    return %arg0, %1, %c0_i32 : i32, i32, i32
  }
}

</mosaic_0001>

<bundles_post_ra>
// kernel: tpu_custom_call.1
= control target key start
LH: loop header
LB: loop body
LE: loop exit
PB: predicated region body
PF: predicated region fallthrough
CT: control target
= control target key end

     0   :  { %s2058_s0 = inlined_call_operand.<no memory space> [shape: s32[1], index: 0, kind: input, shape index: {}]   ;;  %s2059_s1 = inlined_call_operand.<no memory space> [shape: s32[1], index: 1, kind: input, shape index: {}]   ;;  %s2060_s2 = inlined_call_operand.hbm [shape: f32[2,8,8], index: 2, kind: input, shape index: {}]   ;;  %s2061_s3 = inlined_call_operand.hbm [shape: f32[2,8,8], index: 3, kind: input, shape index: {}]   ;;  %s2062_s4 = inlined_call_operand.hbm [shape: f32[2,8,8], index: 4, kind: input, shape index: {}]   ;;  %s2063_s5 = inlined_call_operand.hbm [shape: f32[2,8,8], index: 5, kind: output, shape index: {}]  }
   0x1   :  { %2079 = sst [smem:[#allocation30_spill]] %s2061_s3 }
   0x2   :  { %2080 = sst [smem:[#allocation31_spill]] %s2063_s5 }
   0x3   :  { %10 = sst [smem:[#allocation6]] %s2058_s0 }
   0x4   :  { %11 = sst [smem:[#allocation7]] %s2059_s1 }
   0x5   :  { %12 = vsyncpa [#allocation9], 0 }
   0x6   :  { %14 = vsyncpa [#allocation9 + $0x1], 0 }
   0x7   :  { %15 = vsyncpa [#allocation12], 0 }
   0x8   :  { %17 = vsyncpa [#allocation12 + $0x1], 0 }
   0x9   :  { %18 = vsyncpa [#allocation10], 0 }
   0xa   :  { %20 = vsyncpa [#allocation10 + $0x1], 0  ;;  %s1653_s22 = smov 0   ;;  %s1655_s23 = smov 0  }
   0xb   :  { %s1657_s24 = smov 0   ;;  %s1659_s25 = smov 0  }
   0xc   :  { %s1661_s26 = smov 0   ;;  %s1663_s0 = smov 0  }
   0xd   :  { %s1665_s27 = smov 0   ;;  %s1667_s1 = smov 0  }
   0xe   :  { %s1669_s28 = smov 0   ;;  %s1671_s29 = smov 0  }
   0xf   :  { %s1673_s30 = smov 0   ;;  %s1675_s6 = smov 0  }
  0x10   :  { %s1677_s7 = smov 0   ;;  %s1679_s8 = smov 0  }
  0x11   :  { %s1681_s9 = smov 0  }
  0x12 LB: > { %2081 = sst [smem:[#allocation19_spill]] %s1555_s22  ;;  %s1727_s10 = sadd.s32 4294967295, %s1611_s9   ;;  %s1611_s9 = sphi %s1681_s9, %s26_s9   ;;  %s1607_s8 = sphi %s1679_s8, %s2130_s8   ;;  %s1603_s7 = sphi %s1677_s7, %s2129_s7   ;;  %s1599_s6 = sphi %s1675_s6, %s2141_s6   ;;  %s1595_s30 = sphi %s1673_s30, %s2140_s30   ;;  %s1591_s29 = sphi %s1671_s29, %s2139_s29   ;;  %s1587_s28 = sphi %s1669_s28, %s2138_s28   ;;  %s1583_s1 = sphi %s1667_s1, %s2137_s1   ;;  %s1579_s27 = sphi %s1665_s27, %s2126_s27   ;;  %s1575_s0 = sphi %s1663_s0, %s2136_s0   ;;  %s1571_s26 = sphi %s1661_s26, %s2135_s26   ;;  %s1567_s25 = sphi %s1659_s25, %s2134_s25   ;;  %s1563_s24 = sphi %s1657_s24, %s2133_s24   ;;  %s1559_s23 = sphi %s1655_s23, %s2132_s23   ;;  %s1555_s22 = sphi %s1653_s22, %s2131_s22  }
  0x13   : > { %2082 = sst [smem:[#allocation20_spill]] %s1559_s23  ;;  %s1175_s11 = sadd.s32 4294967294, %s1611_s9  }
  0x14   : > { %2083 = sst [smem:[#allocation21_spill]] %s1583_s1  ;;  %s38_s12 = sadd.s32 1, %s1607_s8 }
  0x15   : > { %2084 = sst [smem:[#allocation22_spill]] %s1603_s7  ;;  %p2077_p0 = scmp.eq.s32.totalorder %s1611_s9, 0 }
  0x16   : > { %2085 = sst [smem:[#allocation23_spill]] %s1607_s8  ;;  %p40_p1 = scmp.ge.s32.totalorder %s38_s12, 2 }
  0x17   : > { %p2075_p2 = scmp.eq.s32.totalorder %s1727_s10, 0  ;;  %s72_s13 = sld [smem:[#allocation7]] }
  0x18   : > { %s79_s14 = sadd.s32 1, %s1587_s28  ;;  %s2143_s12 = smov (%p40_p1, %s38_s12), 0 }
  0x19   : > { %2086 = sst [smem:[#allocation24_spill]] %s2143_s12  ;;  %p86_p3 = scmp.ne.s32.totalorder %s1587_s28, %s1583_s1 }
  0x1a   : > { %p92_p4 = scmp.ne.s32.totalorder %s1583_s1, %s1579_s27  ;;  %s44_s15 = ssub.s32 %s1607_s8, %s2143_s12 }
  0x1b   : > { %s1741_s16 = sld [smem:[#allocation6]]  ;;  %p1745_p5 = por %p86_p3, %p2077_p0 }
  0x1c   : > { %p1751_p6 = por %p92_p4, %p2075_p2  ;;  %s139_s19 = sadd.s32 1, %s1563_s24 }
  0x1d   : > { %p149_p7 = scmp.ne.s32.totalorder %s1563_s24, %s1559_s23  ;;  %p150_p8 = scmp.eq.s32.totalorder %s1727_s10, 1 }
  0x1e   : > { %s2088_s18 = scalar_select %p1751_p6, 1, 0 }
  0x1f   : > { %p155_p9 = scmp.ne.s32.totalorder %s1559_s23, %s1555_s22  ;;  %p1761_p10 = scmp.eq.s32.totalorder %s44_s15, 0 }
  0x20   : > { %2089 = sst [smem:[#allocation25_spill]] %s2088_s18  ;;  %p1765_p11 = por %p150_p8, %p149_p7 }
  0x21   : > { %p156_p12 = scmp.eq.s32.totalorder %s1175_s11, 1  ;;  %p2076_p3 = scmp.lt.s32.totalorder %s1611_s9, 2 }
  0x22   : > { %s2091_s21 = scalar_select %p1765_p11, 1, 0 }
  0x23   : > { %s1772_s27 = scalar_select %p1761_p10, %s1587_s28, %s79_s14  }
  0x24   : > { %2092 = sst [smem:[#allocation26_spill]] %s2091_s21  ;;  %p1774_p13 = por %p156_p12, %p155_p9 }
  0x25   : > { %2093 = sst [smem:[#allocation27_spill]] %s1772_s27  ;;  %s197_s15 = sand.u32 1, %s1611_s9  }
  0x26   : > { %s2094_s12 = scalar_select %p1774_p13, 1, 0 }
  0x27   : > { %s1784_s22 = scalar_select %p1761_p10, %s1563_s24, %s139_s19  }
  0x28   : > { %2095 = sst [smem:[#allocation28_spill]] %s2094_s12  ;;  %s199_s5 = sand.u32 1, %s1587_s28  }
  0x29   : > { %s1180_s21 = sshll.u32 %s199_s5, 3  ;;  %s205_s11 = sadd.s32 %s1607_s8, %s72_s13 }
  0x2a   : > { %s1788_s7 = sshll.u32 %s205_s11, 3  ;;  %s2096_s3 = sld [smem:[#allocation30_spill]] }
  0x2b   : > { %s201_s18 = scalar_lea.vmem [#allocation11], %s1180_s21  ;;  %p1798_p4 = pnand %p2076_p3, %p1745_p5 }
  0x2c   : > { %s211_s12 = sshll.u32 %s201_s18, 4  ;;  %p237_p8 = scmp.lt.s32.totalorder %s1611_s9, 3  ;;  %s212_s12 = int_to_ptr.vmem [resolvable:$true] %s211_s12 }
  0x2d   : > { %s1804_s5 = scalar_lea.sflag [#allocation12], %s197_s15  ;;  %p1363_p12 = pneg %p1798_p4 }
  0x30   : > { %s207_s23 = scalar_lea.hbm %s2096_s3, %s1788_s7  ;;  %s1366_s18 = scalar_lea.hbm %s2096_s3, 16 }
  0x31   : > { %s209_s1 = sshll.u32 %s207_s23, 4  ;;  %s210_s1 = int_to_ptr.hbm [resolvable:$true] %s209_s1 }
  0x32   : > { %s1359_s13 = sshra.s32 %s210_s1, 4  ;;  %s1360_s13 = int_to_ptr.hbm [resolvable:$true] %s1359_s13 }
  0x33   : > { %s1361_s27 = scalar_lea.hbm %s1360_s13, 8  ;;  %p1367_p5 = scmp.lt.s32.totalorder %s1360_s13, %s2096_s3 }
  0x34   : > { %p1362_p9 = scmp.ne.s32.totalorder %s1360_s13, %s1361_s27  ;;  %p1368_p3 = scmp.lt.s32.totalorder %s1366_s18, %s1361_s27 }
  0x36   : > { %p1364_p1 = pnand %p1363_p12, %p1362_p9  ;;  %p1369_p0 = por %p1368_p3, %p1367_p5 }
  0x38   : > { %p1365_p2 = pneg %p1364_p1 }
  0x3a   : > { %p1370_p7 = pnand %p1369_p0, %p1365_p2 }
  0x3c   : > { %1373 = shalt.err (!%p1370_p7)
}
  0x3d   : > { %1210 = dma.hbm_to_vmem [thread:$0]  (!%p1798_p4), %s210_s1, 128, %s212_s12, %s1804_s5  }
  0x3e   : > { %p2098_p0 = scmp.ge.s32.totalorder %s1611_s9, 1  ;;  %s49_s14 = sadd.s32 1, %s1599_s6 }
  0x3f   : > { %p56_p1 = scmp.ne.s32.totalorder %s1599_s6, %s1595_s30  ;;  %p2101_p3 = scmp.eq.s32.totalorder %s1611_s9, 0 }
  0x40   : > { %p1821_p2 = pnand %p2098_p0, %p237_p8  ;;  %p62_p9 = scmp.ne.s32.totalorder %s1595_s30, %s1591_s29 }
  0x41   : > { %s1831_s19 = scalar_select %p1761_p10, %s1599_s6, %s49_s14  }
  0x42   : > { %p1835_p7 = por %p2101_p3, %p56_p1  ;;  %s176_s1 = sand.u32 1, %s1599_s6  }
  0x43   : > { %2100 = sst [smem:[#allocation29_spill]] %s1831_s19  ;;  %s184_s12 = sadd.s32 %s1607_s8, %s1741_s16 }
  0x44   : > { %p2103_p4 = scmp.eq.s32.totalorder %s1727_s10, 0  ;;  %s1178_s23 = sshll.u32 %s176_s1, 3 }
  0x45   : > { %s1179_s17 = sshll.u32 %s184_s12, 3  ;;  %s180_s3 = scalar_lea.vmem [#allocation8], %s1178_s23 }
  0x46   : > { %p1846_p8 = por %p2103_p4, %p62_p9  ;;  %s186_s11 = scalar_lea.hbm %s2060_s2, %s1179_s17 }
  0x47   : > { %s188_s14 = sshll.u32 %s186_s11, 4  ;;  %s190_s19 = sshll.u32 %s180_s3, 4  ;;  %s189_s14 = int_to_ptr.hbm [resolvable:$true] %s188_s14  ;;  %s191_s19 = int_to_ptr.vmem [resolvable:$true] %s190_s19 }
  0x48   : > { %p2105_p12 = scmp.lt.s32.totalorder %s1611_s9, 2  ;;  %s177_s16 = scalar_lea.sflag [#allocation9], %s176_s1 }
  0x49   : > { %s1389_s8 = sshra.s32 %s189_s14, 4  ;;  %s1396_s17 = scalar_lea.hbm %s2060_s2, 16  ;;  %s1390_s8 = int_to_ptr.hbm [resolvable:$true] %s1389_s8 }
  0x4a   : > { %p1857_p5 = pnand %p2105_p12, %p1835_p7  ;;  %s1391_s12 = scalar_lea.hbm %s1390_s8, 8 }
  0x4b   : > { %p1392_p0 = scmp.ne.s32.totalorder %s1390_s8, %s1391_s12  ;;  %p1397_p7 = scmp.lt.s32.totalorder %s1390_s8, %s2060_s2 }
  0x4c   : > { %p1393_p1 = pneg %p1857_p5  ;;  %p1398_p4 = scmp.lt.s32.totalorder %s1396_s17, %s1391_s12 }
  0x4e   : > { %p1394_p3 = pnand %p1393_p1, %p1392_p0  ;;  %p1399_p12 = por %p1398_p4, %p1397_p7 }
  0x50   : > { %p1395_p9 = pneg %p1394_p3 }
  0x52   : > { %p1400_p13 = pnand %p1399_p12, %p1395_p9 }
  0x54   : > { %1403 = shalt.err (!%p1400_p13)
}
  0x55   : > { %1207 = dma.hbm_to_vmem [thread:$0]  (!%p1857_p5), %s189_s14, 128, %s191_s19, %s177_s16  }
  0x56   : > { %s109_s8 = sadd.s32 1, %s1575_s0  ;;  %p116_p0 = scmp.ne.s32.totalorder %s1575_s0, %s1571_s26 }
  0x57   : > { %s1877_s1 = scalar_select %p1761_p10, %s1575_s0, %s109_s8  }
  0x58   : > { %p2107_p13 = scmp.eq.s32.totalorder %s1611_s9, 0  ;;  %p122_p3 = scmp.ne.s32.totalorder %s1571_s26, %s1567_s25 }
  0x59   : > { %s220_s21 = sand.u32 1, %s1575_s0   ;;  %s228_s12 = scalar_lea.hbm %s2062_s4, %s1788_s7 }
  0x5a   : > { %p118_p1 = por %p116_p0, %p2107_p13  ;;  %p2108_p9 = scmp.eq.s32.totalorder %s1727_s10, 0 }
  0x5b   : > { %s1182_s3 = sshll.u32 %s220_s21, 3  ;;  %s230_s19 = sshll.u32 %s228_s12, 4  ;;  %s231_s19 = int_to_ptr.hbm [resolvable:$true] %s230_s19 }
  0x5c   : > { %p1890_p7 = por %p122_p3, %p2108_p9  ;;  %s222_s14 = scalar_lea.vmem [#allocation13], %s1182_s3 }
  0x5d   : > { %s232_s20 = sshll.u32 %s222_s14, 4  ;;  %p2110_p10 = scmp.lt.s32.totalorder %s1611_s9, 2  ;;  %s233_s20 = int_to_ptr.vmem [resolvable:$true] %s232_s20 }
  0x5e   : > { %s1419_s25 = sshra.s32 %s231_s19, 4  ;;  %s1426_s18 = scalar_lea.hbm %s2062_s4, 16  ;;  %s1420_s25 = int_to_ptr.hbm [resolvable:$true] %s1419_s25 }
  0x5f   : > { %p1896_p5 = pnand %p2110_p10, %p118_p1  ;;  %s1421_s7 = scalar_lea.hbm %s1420_s25, 8 }
  0x60   : > { %p1422_p4 = scmp.ne.s32.totalorder %s1420_s25, %s1421_s7  ;;  %p1427_p1 = scmp.lt.s32.totalorder %s1420_s25, %s2062_s4 }
  0x61   : > { %p1423_p12 = pneg %p1896_p5  ;;  %p1428_p3 = scmp.lt.s32.totalorder %s1426_s18, %s1421_s7 }
  0x63   : > { %p1424_p0 = pnand %p1423_p12, %p1422_p4  ;;  %p1429_p9 = por %p1428_p3, %p1427_p1 }
  0x65   : > { %p1425_p13 = pneg %p1424_p0 }
  0x67   : > { %p1430_p10 = pnand %p1429_p9, %p1425_p13 }
  0x69   : > { %1433 = shalt.err (!%p1430_p10)
}
  0x6a   : > { %1213 = dma.hbm_to_vmem [thread:$0]  (!%p1896_p5), %s231_s19, 128, %s233_s20, %s1804_s5  }
  0x6b   : > { %241 = sbr.rel (%p1821_p2) target bundleno = 1372 (0x55c), region = 32  ;;  %s243_s11 = sand.u32 (!%p1821_p2), 1, %s1595_s30  }
  0x6c   : > { %s1914_s29 = sshll.u32 (!%p1821_p2), %s243_s11, 3  ;;  %s244_s12 = scalar_lea.sflag (!%p1821_p2), [#allocation9], %s243_s11 }
  0x6d   : > { %s247_s3 = scalar_lea.vmem (!%p1821_p2), [#allocation8], %s1914_s29 }
  0x70   : > { %1538 = dma.done.wait (%p1846_p8), %s244_s12, 128  }
  0x71   : > { %1540 = vsyncadd (%p1846_p8), %s244_s12, 4294967168  ;;  %s2112_s14 = sld [smem:[#allocation21_spill]]  ;;  %s253_s5 = sand.u32 1, %s1727_s10  }
  0x72   : > { %s254_s20 = scalar_lea.sflag [#allocation12], %s253_s5 }
  0x77   : > { %s255_s19 = sand.u32 1, %s2112_s14  }
  0x78   : > { %s1923_s15 = sshll.u32 %s255_s19, 3 }
  0x79   : > { %s257_s25 = scalar_lea.vmem [#allocation11], %s1923_s15 }
  0x7a   : > { %1542 = dma.done.wait (%p1751_p6), %s254_s20, 128  }
  0x7b   : > { %1544 = vsyncadd (%p1751_p6), %s254_s20, 4294967168  ;;  %s265_s7 = sand.u32 1, %s1571_s26  }
  0x7c   : > { %s1931_s27 = sshll.u32 %s265_s7, 3 }
  0x7d   : > { %s267_s17 = scalar_lea.vmem [#allocation13], %s1931_s27 }
  0x7e   : > { %1546 = dma.done.wait (%p1890_p7), %s254_s20, 128  }
  0x7f   : > { %1548 = vsyncadd (%p1890_p7), %s254_s20, 4294967168  ;;  %s2114_s10 = sld [smem:[#allocation20_spill]] }
  0x80   : > { %s1939_s18 = sld [smem:[#allocation6]] }
  0x81   : > { %s1945_s21 = sld [smem:[#allocation7]] }
  0x85   : > { %s298_s13 = sand.u32 1, %s2114_s10  }
  0x86   : > { %s1943_s8 = sshll.u32 %s298_s13, 3 }
  0x87   : > { %s300_s11 = scalar_lea.vmem [#allocation14], %s1943_s8  ;;  %p1189_p6 = scmp.ne.s32.totalorder %s1945_s21, 0 }
  0x89   : > { %310 = sbr.rel (%p1189_p6) target bundleno = 146 (0x92), region = 48 }
  0x8e   : > { %vm311_vm0 = vcmask 7168   ;;  %vm314_vm1 = vcmask 64512   ;;  %v1613_v0 = vmov -2.3819763e+38   ;;  %v1614_v1 = vmov 0.0  }
  0x8f   : > { %312 = vst.msk [vmem:[#allocation2] sm:$0xff] %vm311_vm0, %v1613_v0 }
  0x90   : > { %313 = vst.msk [vmem:[#allocation3] sm:$0xff] %vm311_vm0, %v1614_v1 }
  0x91   : > { %315 = vst.msk [vmem:[#allocation4] sm:$0xff] %vm314_vm1, %v1614_v1 }
  0x92 PF: > { %p1190_p2 = scmp.ge.s32.totalorder %s1945_s21, %s1939_s18 }
  0x94   : > { %319 = sbr.rel (%p1190_p2) target bundleno = 707 (0x2c3), region = 52 }
  0x99   : > { %v321_v2 = vld [vmem:[%s257_s25] sm:$0xff]  ;;  %vm322_vm2 = vcmask 64512   ;;  %v320_v3 = vld [vmem:[%s247_s3] sm:$0xff]  ;;  %v1615_v28 = vmov 0   ;;  %vm497_vm3 = vcmask 7168  }
  0x9a   : > { %v327_v4 = vsel %vm322_vm2, %v321_v2, 0  ;;  %v324_v5 = vsel %vm322_vm2, %v320_v3, 0  ;;  %1344 = vset.pattern.permute.xlu0 %v1615_v28  ;;  %1345 = vset.pattern.permute.xlu1 %v1615_v28  ;;  %v475_v29 = vld [vmem:[#allocation2] sm:$0xff]  ;;  %v491_v53 = vld [vmem:[#allocation3] sm:$0xff]  ;;  %v499_v0 = vld [vmem:[#allocation4] sm:$0xff] }
  0x9b   : > { %v344_v6 = vand.u32 4294901760, %v327_v4  ;;  %v346_v7 = vand.u32 4294901760, %v324_v5  ;;  %v506_v35 = vld [vmem:[%s267_s17] sm:$0xff] }
  0x9c   : > { %v525_v36 = vand.u32 4294901760, %v506_v35 }
  0x9d   : > { %v371_v8 = vsub.f32 %v327_v4, %v344_v6  ;;  %345 = vmatpush.xpose.msra.mxu0 %v344_v6  ;;  %421 = vmatpush.xpose.msra.mxu3 %v344_v6  ;;  %v347_v9 = vsub.f32 %v324_v5, %v346_v7 }
  0x9e   : > { %v552_v37 = vsub.f32 %v506_v35, %v525_v36 }
  0x9f   : > { %398 = vmatpush.xpose.msra.mxu2 %v371_v8  ;;  %v372_v10 = vand.u32 4294901760, %v371_v8  ;;  %v348_v11 = vand.u32 4294901760, %v347_v9 }
  0xa0   : > { %v553_v38 = vand.u32 4294901760, %v552_v37 }
  0xa1   : > { %v373_v12 = vsub.f32 %v371_v8, %v372_v10  ;;  %v349_v13 = vsub.f32 %v347_v9, %v348_v11  ;;  %425 = vmatmul.f32.vlgmr.msra.gmra.mxu3 %v348_v11  ;;  %447 = vmatpush.xpose.msrb.mxu0 %v372_v10 }
  0xa2   : > { %401 = vmatmul.f32.vlgmr.msra.gmra.mxu2 %v347_v9  ;;  %v554_v39 = vsub.f32 %v552_v37, %v553_v38 }
  0xa3   : > { %v374_v14 = vand.u32 4294901760, %v373_v12  ;;  %v350_v15 = vand.u32 4294901760, %v349_v13  ;;  %526 = vmatpush.msrb.mxu2 %v525_v36 }
  0xa4   : > { %v555_v40 = vand.u32 4294901760, %v554_v39 }
  0xa5   : > { %375 = vmatpush.xpose.msra.mxu1 %v374_v14  ;;  %351 = vmatmul.f32.vlgmr.msra.gmra.mxu0 %v350_v15 }
  0xa6   : > { %579 = vmatpush.msra.mxu0 %v552_v37  ;;  %628 = vmatpush.msra.mxu2 %v553_v38 }
  0xa7   : > { %556 = vmatpush.msrb.mxu3 %v555_v40 }
  0xa8   : > { %377 = vmatmul.f32.vlgmr.msra.gmra.mxu1 %v346_v7 }
  0xa9   : > { %469 = vmatpush.xpose.msrb.mxu1 %v344_v6  ;;  %650 = vmatpush.msra.mxu3 %v525_v36 }
  0xad   : > { %449 = vmatmul.f32.vlgmr.msrb.gmra.mxu0 %v346_v7  ;;  %602 = vmatpush.msra.mxu1 %v525_v36 }
  0xb0   : > { %471 = vmatmul.f32.vlgmr.msrb.gmra.mxu1 %v346_v7 }
 0x122   : > { %v352_v16 = vpop.f32.mrf.mxu0 }
 0x124   : > { %v426_v20 = vpop.f32.mrf.mxu3 }
 0x125   : > { %v378_v17 = vpop.f32.mrf.mxu1  ;;  %v402_v18 = vpop.f32.mrf.mxu2 }
 0x126   : > { %v379_v19 = vadd.f32 %v378_v17, %v352_v16 }
 0x128   : > { %v403_v21 = vadd.f32 %v402_v18, %v379_v19 }
 0x12a   : > { %v427_v22 = vadd.f32 %v426_v20, %v403_v21  ;;  %v450_v23 = vpop.f32.mrf.mxu0 }
 0x12c   : > { %v451_v24 = vadd.f32 %v450_v23, %v427_v22 }
 0x12d   : > { %v472_v25 = vpop.f32.mrf.mxu1 }
 0x12e   : > { %v473_v26 = vadd.f32 %v472_v25, %v451_v24 }
 0x130   : > { %v476_v27 = vsel %vm322_vm2, %v473_v26, -inf }
 0x131   : > { %477 = vmax.xlane.f32.xlu0 %v476_v27 }
 0x1a4   : > { %v478_v30 = vpop.xlane.xlu0 %477 }
 0x1a5   : > { %v479_v31 = vmax.f32 %v475_v29, %v478_v30 }
 0x1a7   : > { %v480_v32 = vsub.f32 %v475_v29, %v479_v31  ;;  %658 = vst.msk [vmem:[#allocation2] sm:$0xff] %vm497_vm3, %v479_v31  ;;  %485 = vperm.xlu0 %1344, %v479_v31  }
 0x1a9   : > { %v481_v33 = vmul.f32 1.442695, %v480_v32 }
 0x1ab   : > { %1346 = vpow2.f32 %v481_v33 }
 0x1b1   : > { %v1347_v34 = vpop.eup %1346 }
 0x1b2   : > { %502 = vperm.xlu1 %1345, %v1347_v34   ;;  %v492_v54 = vmul.f32 %v1347_v34, %v491_v53 }
 0x219   : > { %v486_v41 = vpop.permute.xlu0 %485 }
 0x21a   : > { %v488_v42 = vsub.f32 %v473_v26, %v486_v41 }
 0x21c   : > { %v489_v43 = vmul.f32 1.442695, %v488_v42 }
 0x21e   : > { %1348 = vpow2.f32 %v489_v43 }
 0x224   : > { %v1349_v44 = vpop.eup %1348  ;;  %v503_v52 = vpop.permute.xlu1 %502 }
 0x225   : > { %v493_v45 = vsel %vm322_vm2, %v1349_v44, 0.0  ;;  %v508_v46 = vsel %vm322_vm2, %v1349_v44, 0  ;;  %v505_v4 = vmul.f32 %v503_v52, %v499_v0 }
 0x226   : > { %494 = vadd.xlane.f32.xlu1 %v493_v45  ;;  %v527_v47 = vand.u32 4294901760, %v508_v46 }
 0x228   : > { %558 = vmatmul.f32.vlgmr.msrb.gmra.mxu3 %v527_v47  ;;  %v528_v48 = vsub.f32 %v508_v46, %v527_v47 }
 0x22a   : > { %582 = vmatmul.f32.vlgmr.msra.gmra.mxu0 %v528_v48  ;;  %v529_v49 = vand.u32 4294901760, %v528_v48 }
 0x22c   : > { %606 = vmatmul.f32.vlgmr.msra.gmra.mxu1 %v529_v49  ;;  %v530_v50 = vsub.f32 %v528_v48, %v529_v49 }
 0x22e   : > { %v531_v51 = vand.u32 4294901760, %v530_v50 }
 0x230   : > { %532 = vmatmul.f32.vlgmr.msrb.gmra.mxu2 %v531_v51  ;;  %652 = vmatmul.f32.vlgmr.msra.gmra.mxu3 %v527_v47 }
 0x238   : > { %630 = vmatmul.f32.vlgmr.msra.gmra.mxu2 %v527_v47 }
 0x299   : > { %v495_v55 = vpop.xlane.xlu1 %494 }
 0x29a   : > { %v496_v56 = vadd.f32 %v495_v55, %v492_v54 }
 0x29c   : > { %498 = vst.msk [vmem:[#allocation3] sm:$0xff] %vm497_vm3, %v496_v56 }
 0x2a7   : > { %v583_v60 = vpop.f32.mrf.mxu0 }
 0x2a9   : > { %v607_v62 = vpop.f32.mrf.mxu1 }
 0x2ab   : > { %v559_v57 = vpop.f32.mrf.mxu3 }
 0x2b3   : > { %v533_v58 = vpop.f32.mrf.mxu2  ;;  %v653_v3 = vpop.f32.mrf.mxu3 }
 0x2b4   : > { %v560_v59 = vadd.f32 %v559_v57, %v533_v58 }
 0x2b6   : > { %v584_v61 = vadd.f32 %v583_v60, %v560_v59 }
 0x2b8   : > { %v608_v63 = vadd.f32 %v607_v62, %v584_v61 }
 0x2bb   : > { %v631_v1 = vpop.f32.mrf.mxu2 }
 0x2bc   : > { %v632_v2 = vadd.f32 %v631_v1, %v608_v63 }
 0x2be   : > { %v654_v5 = vadd.f32 %v653_v3, %v632_v2 }
 0x2c0   : > { %v656_v6 = vadd.f32 %v654_v5, %v505_v4 }
 0x2c2   : > { %657 = vst.msk [vmem:[#allocation4] sm:$0xff] %vm322_vm2, %v656_v6 }
 0x2c3 PF: > { %p1191_p8 = scmp.ne.s32.totalorder %s1945_s21, %s1939_s18 }
 0x2c5   : > { %662 = sbr.rel (%p1191_p8) target bundleno = 1349 (0x545), region = 56 }
 0x2ca   : > { %v664_v7 = vld [vmem:[%s257_s25] sm:$0xff]  ;;  %vm665_vm4 = vcmask 64512   ;;  %v663_v8 = vld [vmem:[%s247_s3] sm:$0xff]  ;;  %v818_v24 = vlaneseq  ;;  %v1616_v37 = vmov 0   ;;  %vm846_vm6 = vcmask 7168  }
 0x2cb   : > { %v670_v9 = vsel %vm665_vm4, %v664_v7, 0  ;;  %v667_v10 = vsel %vm665_vm4, %v663_v8, 0  ;;  %1350 = vset.pattern.permute.xlu0 %v1616_v37  ;;  %1351 = vset.pattern.permute.xlu1 %v1616_v37  ;;  %v824_v38 = vld [vmem:[#allocation2] sm:$0xff]  ;;  %v840_v61 = vld [vmem:[#allocation3] sm:$0xff] }
 0x2cc   : > { %v687_v11 = vand.u32 4294901760, %v670_v9  ;;  %v689_v12 = vand.u32 4294901760, %v667_v10  ;;  %v819_v28 = vshrl.u32 %v818_v24, 7  ;;  %v821_v29 = vand.u32 127, %v818_v24  ;;  %1352 = vset.pattern.permute.xlu2 %v1616_v37  ;;  %v855_v42 = vld [vmem:[%s267_s17] sm:$0xff] }
 0x2cd   : > { %v874_v43 = vand.u32 4294901760, %v855_v42 }
 0x2ce   : > { %v714_v13 = vsub.f32 %v670_v9, %v687_v11  ;;  %688 = vmatpush.xpose.msra.mxu0 %v687_v11  ;;  %764 = vmatpush.xpose.msra.mxu3 %v687_v11  ;;  %v690_v14 = vsub.f32 %v667_v10, %v689_v12  ;;  %vm822_vm5 = vcmp.le.s32.totalorder %v821_v29, %v819_v28 }
 0x2cf   : > { %v901_v44 = vsub.f32 %v855_v42, %v874_v43 }
 0x2d0   : > { %741 = vmatpush.xpose.msra.mxu2 %v714_v13  ;;  %v715_v15 = vand.u32 4294901760, %v714_v13  ;;  %v691_v16 = vand.u32 4294901760, %v690_v14 }
 0x2d1   : > { %v902_v45 = vand.u32 4294901760, %v901_v44 }
 0x2d2   : > { %v716_v17 = vsub.f32 %v714_v13, %v715_v15  ;;  %v692_v18 = vsub.f32 %v690_v14, %v691_v16  ;;  %768 = vmatmul.f32.vlgmr.msra.gmra.mxu3 %v691_v16  ;;  %790 = vmatpush.xpose.msrb.mxu0 %v715_v15 }
 0x2d3   : > { %744 = vmatmul.f32.vlgmr.msra.gmra.mxu2 %v690_v14  ;;  %v903_v46 = vsub.f32 %v901_v44, %v902_v45 }
 0x2d4   : > { %v717_v19 = vand.u32 4294901760, %v716_v17  ;;  %v693_v20 = vand.u32 4294901760, %v692_v18  ;;  %875 = vmatpush.msrb.mxu2 %v874_v43 }
 0x2d5   : > { %v904_v47 = vand.u32 4294901760, %v903_v46 }
 0x2d6   : > { %718 = vmatpush.xpose.msra.mxu1 %v717_v19  ;;  %694 = vmatmul.f32.vlgmr.msra.gmra.mxu0 %v693_v20  ;;  %v848_v19 = vld [vmem:[#allocation4] sm:$0xff] }
 0x2d7   : > { %928 = vmatpush.msra.mxu0 %v901_v44  ;;  %977 = vmatpush.msra.mxu2 %v902_v45 }
 0x2d8   : > { %905 = vmatpush.msrb.mxu3 %v904_v47 }
 0x2d9   : > { %720 = vmatmul.f32.vlgmr.msra.gmra.mxu1 %v689_v12 }
 0x2da   : > { %812 = vmatpush.xpose.msrb.mxu1 %v687_v11  ;;  %999 = vmatpush.msra.mxu3 %v874_v43 }
 0x2de   : > { %792 = vmatmul.f32.vlgmr.msrb.gmra.mxu0 %v689_v12  ;;  %951 = vmatpush.msra.mxu1 %v874_v43 }
 0x2e1   : > { %814 = vmatmul.f32.vlgmr.msrb.gmra.mxu1 %v689_v12 }
 0x353   : > { %v695_v21 = vpop.f32.mrf.mxu0 }
 0x355   : > { %v769_v26 = vpop.f32.mrf.mxu3 }
 0x356   : > { %v721_v22 = vpop.f32.mrf.mxu1  ;;  %v745_v23 = vpop.f32.mrf.mxu2 }
 0x357   : > { %v722_v25 = vadd.f32 %v721_v22, %v695_v21 }
 0x359   : > { %v746_v27 = vadd.f32 %v745_v23, %v722_v25 }
 0x35b   : > { %v770_v30 = vadd.f32 %v769_v26, %v746_v27  ;;  %v793_v31 = vpop.f32.mrf.mxu0 }
 0x35d   : > { %v794_v32 = vadd.f32 %v793_v31, %v770_v30 }
 0x35e   : > { %v815_v33 = vpop.f32.mrf.mxu1 }
 0x35f   : > { %v816_v34 = vadd.f32 %v815_v33, %v794_v32 }
 0x361   : > { %v823_v35 = vsel %vm822_vm5, %v816_v34, -2.3819763e+38 }
 0x362   : > { %v825_v36 = vsel %vm665_vm4, %v823_v35, -inf }
 0x363   : > { %826 = vmax.xlane.f32.xlu0 %v825_v36 }
 0x3d6   : > { %v827_v39 = vpop.xlane.xlu0 %826 }
 0x3d7   : > { %v828_v40 = vmax.f32 %v824_v38, %v827_v39 }
 0x3d9   : > { %v829_v41 = vsub.f32 %v824_v38, %v828_v40  ;;  %1007 = vst.msk [vmem:[#allocation2] sm:$0xff] %vm846_vm6, %v828_v40  ;;  %834 = vperm.xlu0 %1350, %v828_v40  }
 0x3db   : > { %v830_v59 = vmul.f32 1.442695, %v829_v41 }
 0x44b   : > { %v835_v48 = vpop.permute.xlu0 %834 }
 0x44c   : > { %v837_v49 = vsub.f32 %v823_v35, %v835_v48 }
 0x44e   : > { %v838_v50 = vmul.f32 1.442695, %v837_v49 }
 0x450   : > { %1353 = vpow2.f32 %v838_v50 }
 0x451   : > { %1355 = vpow2.f32 %v830_v59 }
 0x456   : > { %v1354_v51 = vpop.eup %1353 }
 0x457   : > { %v842_v52 = vsel %vm665_vm4, %v1354_v51, 0.0  ;;  %v857_v53 = vsel %vm665_vm4, %v1354_v51, 0  ;;  %v1356_v60 = vpop.eup %1355 }
 0x458   : > { %843 = vadd.xlane.f32.xlu1 %v842_v52  ;;  %v876_v54 = vand.u32 4294901760, %v857_v53  ;;  %v841_v62 = vmul.f32 %v1356_v60, %v840_v61 }
 0x45a   : > { %907 = vmatmul.f32.vlgmr.msrb.gmra.mxu3 %v876_v54  ;;  %v877_v55 = vsub.f32 %v857_v53, %v876_v54 }
 0x45c   : > { %931 = vmatmul.f32.vlgmr.msra.gmra.mxu0 %v877_v55  ;;  %v878_v56 = vand.u32 4294901760, %v877_v55 }
 0x45e   : > { %955 = vmatmul.f32.vlgmr.msra.gmra.mxu1 %v878_v56  ;;  %v879_v57 = vsub.f32 %v877_v55, %v878_v56 }
 0x460   : > { %v880_v58 = vand.u32 4294901760, %v879_v57 }
 0x462   : > { %881 = vmatmul.f32.vlgmr.msrb.gmra.mxu2 %v880_v58  ;;  %1001 = vmatmul.f32.vlgmr.msra.gmra.mxu3 %v876_v54 }
 0x46a   : > { %979 = vmatmul.f32.vlgmr.msra.gmra.mxu2 %v876_v54 }
 0x471   : > { %851 = vperm.xlu1 %1351, %v1356_v60  }
 0x4cb   : > { %v844_v63 = vpop.xlane.xlu1 %843 }
 0x4cc   : > { %v845_v0 = vadd.f32 %v844_v63, %v841_v62 }
 0x4ce   : > { %847 = vst.msk [vmem:[#allocation3] sm:$0xff] %vm846_vm6, %v845_v0 }
 0x4d5   : > { %v1008_v1 = vld [vmem:[#allocation3] sm:$0xff] }
 0x4d6   : > { %1357 = vrcp.f32 %v1008_v1  ;;  %v1020_v5 = vand.u32 2147483648, %v1008_v1  ;;  %v1018_v7 = vand.u32 2147483647, %v1008_v1  ;;  %vm1014_vm8 = vweird.f32 %v1008_v1 }
 0x4d8   : > { %v1021_v9 = vor.u32 1.1754944e-38, %v1020_v5  ;;  %vm1019_vm10 = vcmp.eq.f32.partialorder %v1018_v7, 8.507059e+37 }
 0x4d9   : > { %v932_v15 = vpop.f32.mrf.mxu0 }
 0x4db   : > { %v956_v17 = vpop.f32.mrf.mxu1 }
 0x4dc   : > { %v1358_v2 = vpop.eup %1357 }
 0x4dd   : > { %v1010_v3 = vmul.f32 %v1358_v2, %v1008_v1  ;;  %vm1015_vm7 = vweird.f32 %v1358_v2  ;;  %v908_v10 = vpop.f32.mrf.mxu3 }
 0x4de   : > { %vm1016_vm9 = vmor %vm1014_vm8, %vm1015_vm7 }
 0x4df   : > { %v1011_v4 = vsub.f32 1.0, %v1010_v3 }
 0x4e1   : > { %v1012_v6 = vmul.f32 %v1358_v2, %v1011_v4 }
 0x4e3   : > { %v1013_v8 = vadd.f32 %v1358_v2, %v1012_v6  ;;  %v852_v20 = vpop.permute.xlu1 %851 }
 0x4e4   : > { %v854_v24 = vmul.f32 %v852_v20, %v848_v19 }
 0x4e5   : > { %v882_v11 = vpop.f32.mrf.mxu2  ;;  %v1017_v12 = vsel %vm1016_vm9, %v1358_v2, %v1013_v8  ;;  %v1002_v23 = vpop.f32.mrf.mxu3 }
 0x4e6   : > { %v909_v13 = vadd.f32 %v908_v10, %v882_v11  ;;  %v1022_v14 = vsel %vm1019_vm10, %v1021_v9, %v1017_v12 }
 0x4e7   : > { %1026 = vperm.xlu2 %1352, %v1022_v14  }
 0x4e8   : > { %v933_v16 = vadd.f32 %v932_v15, %v909_v13 }
 0x4ea   : > { %v957_v18 = vadd.f32 %v956_v17, %v933_v16 }
 0x4ed   : > { %v980_v21 = vpop.f32.mrf.mxu2 }
 0x4ee   : > { %v981_v22 = vadd.f32 %v980_v21, %v957_v18 }
 0x4f0   : > { %v1003_v25 = vadd.f32 %v1002_v23, %v981_v22 }
 0x4f2   : > { %v1005_v26 = vadd.f32 %v1003_v25, %v854_v24 }
 0x4f4   : > { %1006 = vst.msk [vmem:[#allocation4] sm:$0xff] %vm665_vm4, %v1005_v26 }
 0x4fb   : > { %v1023_v27 = vld [vmem:[#allocation4] sm:$0xff] }
 0x541   : > { %v1027_v28 = vpop.permute.xlu2 %1026 }
 0x542   : > { %v1029_v29 = vmul.f32 %v1027_v28, %v1023_v27 }
 0x544   : > { %1030 = vst.msk [vmem:[%s300_s11] sm:$0xff] %vm665_vm4, %v1029_v29 }
 0x545 PF: > { %s1039_s23 = sld [smem:[#allocation6]]  ;;  %s1046_s14 = sshll.u32 %s300_s11, 4  ;;  %s1047_s14 = int_to_ptr.vmem [resolvable:$true] %s1046_s14 }
 0x546   : > { %s2115_s29 = sld [smem:[#allocation22_spill]]  ;;  %s1032_s27 = scalar_lea.sflag [#allocation10], %s298_s13 }
 0x547   : > { %s2118_s20 = sld [smem:[#allocation31_spill]] }
 0x54c   : > { %s1042_s16 = sadd.s32 %s2115_s29, %s1039_s23 }
 0x54d   : > { %s1193_s5 = sshll.u32 %s1042_s16, 3  ;;  %s1469_s21 = scalar_lea.hbm %s2118_s20, 16 }
 0x54e   : > { %s1044_s25 = scalar_lea.hbm %s2118_s20, %s1193_s5 }
 0x54f   : > { %s1048_s7 = sshll.u32 %s1044_s25, 4  ;;  %s1049_s7 = int_to_ptr.hbm [resolvable:$true] %s1048_s7 }
 0x550   : > { %s1463_s17 = sshra.s32 %s1049_s7, 4  ;;  %s1464_s17 = int_to_ptr.hbm [resolvable:$true] %s1463_s17 }
 0x551   : > { %s1465_s10 = scalar_lea.hbm %s1464_s17, 8  ;;  %p1470_p12 = scmp.lt.s32.totalorder %s1464_s17, %s2118_s20 }
 0x552   : > { %p1466_p7 = scmp.ne.s32.totalorder %s1464_s17, %s1465_s10  ;;  %p1471_p0 = scmp.lt.s32.totalorder %s1469_s21, %s1465_s10 }
 0x554   : > { %p1467_p5 = pnand %p1466_p7, %p1765_p11  ;;  %p1472_p13 = por %p1471_p0, %p1470_p12 }
 0x556   : > { %p1468_p4 = pneg %p1467_p5 }
 0x558   : > { %p1473_p1 = pnand %p1472_p13, %p1468_p4 }
 0x55a   : > { %1476 = shalt.err (!%p1473_p1)
}
 0x55b   : > { %1202 = dma.vmem_to_hbm [thread:$0]  (%p1765_p11), %s1047_s14, 128, %s1049_s7, %s1032_s27  }
 0x55c PF: > { %s2119_s13 = sld [smem:[#allocation19_spill]]  ;;  %p2122_p9 = scmp.ge.s32.totalorder %s1611_s9, 2 }
 0x55d   : > { %s2120_s29 = sld [smem:[#allocation28_spill]] }
 0x562   : > { %s1060_s12 = sand.u32 1, %s2119_s13  }
 0x563   : > { %p2121_p3 = scmp.ne.s32.totalorder %s2120_s29, 0  ;;  %s1061_s16 = scalar_lea.sflag [#allocation10], %s1060_s12 }
 0x565   : > { %p1215_p10 = pnand %p2122_p9, %p2121_p3 }
 0x567   : > { %p1216_p6 = pneg %p1215_p10 }
 0x569   : > { %1550 = dma.done.wait (%p1216_p6), %s1061_s16, 128  }
 0x56a   : > { %1552 = vsyncadd (%p1216_p6), %s1061_s16, 4294967168  ;;  %s26_s9 = sadd.s32 1, %s1611_s9   ;;  %s2124_s3 = sld [smem:[#allocation20_spill]] }
 0x56b   : > { %p2008_p2 = scmp.ge.s32.totalorder %s26_s9, 4   ;;  %s2125_s14 = smov %s1784_s22 }
 0x56c   : > { %s2126_s27 = sld [smem:[#allocation21_spill]]  ;;  %s2132_s23 = smov %s1563_s24 }
 0x56d   : > { %s2127_s19 = sld [smem:[#allocation27_spill]]  ;;  %s2133_s24 = smov %s2125_s14 }
 0x56e   : > { %s2128_s15 = sld [smem:[#allocation29_spill]]  ;;  %s2134_s25 = smov %s1571_s26 }
 0x56f   : > { %s2129_s7 = sld [smem:[#allocation23_spill]]  ;;  %s2135_s26 = smov %s1575_s0 }
 0x570   : > { %s2130_s8 = sld [smem:[#allocation24_spill]]  ;;  %s2131_s22 = smov %s2124_s3 }
 0x571   : > { %s2136_s0 = smov %s1877_s1  ;;  %s2137_s1 = smov %s1587_s28 }
 0x572   : > { %s2139_s29 = smov %s1595_s30  ;;  %s2140_s30 = smov %s1599_s6 }
 0x573   : > { %s2138_s28 = smov %s2127_s19  ;;  %25 = sbr.rel (!%p2008_p2) target bundleno = 18 (0x12), region = 113 }
 0x574   : > { %s2141_s6 = smov %s2128_s15 }
 0x578   :  { %1067 = vsyncpa [#allocation9], 1 }
 0x579   :  { %1069 = vsyncpa [#allocation9 + $0x1], 1 }
 0x57a   :  { %1070 = vsyncpa [#allocation12], 1 }
 0x57b   :  { %1072 = vsyncpa [#allocation12 + $0x1], 1 }
 0x57c   :  { %1073 = vsyncpa [#allocation10], 1 }
 0x57d   :  { %1075 = vsyncpa [#allocation10 + $0x1], 1 }

</bundles_post_ra>
